<compile_context>
chip_gen: v7x
topology: tpu7x:2x2x1
jax: 0.10.0
libtpu: 0.0.40
codegen_flags: <defaults>
</compile_context>

<pallas_src>
import functools

import numpy as np
import jax
import jax.numpy as jnp
from jax.experimental import pallas as pl
from jax.experimental.pallas import tpu as pltpu


def _round_up(x, m):
    return (x + m - 1) // m * m


# ----------------------------------------------------------------------------
# Exact real-DFT matrices, padded to Fp = round_up(F, 8) bins and fused:
#   W_fwd [2*Fp, T]   :  z = W_fwd @ x  ->  z[:Fp] = Re(rfft), z[Fp:] = Im(rfft)
#   W_inv [T_out, 2*Fp]:  y = W_inv @ z  ==  irfft(z) at the default output length
# ----------------------------------------------------------------------------
def _dft_matrices(t, f_pad, dtype=jnp.float32):
    nfreq = t // 2 + 1
    n_out = 2 * (nfreq - 1)                   # torch.fft.irfft default length
    n = np.arange(t)[None, :]
    k = np.arange(nfreq)[:, None]
    ang = 2.0 * np.pi * k * n / t
    cos_m = np.cos(ang)                       # Xr = cos_m @ x
    sin_m = -np.sin(ang)                      # Xi = sin_m @ x
    m = np.arange(n_out)[None, :]
    ang_o = 2.0 * np.pi * k * m / n_out
    w = np.full((nfreq, 1), 2.0)
    w[0, 0] = 1.0
    w[-1, 0] = 1.0                            # DC / Nyquist weight 1 (matches irfft)
    icos_m = (w * np.cos(ang_o) / n_out).T    # [T_out, F]
    isin_m = (-w * np.sin(ang_o) / n_out).T   # [T_out, F] (DC/Nyquist rows are 0)

    w_fwd = np.zeros((2 * f_pad, t), np.float64)
    w_fwd[:nfreq] = cos_m
    w_fwd[f_pad:f_pad + nfreq] = sin_m
    w_inv = np.zeros((n_out, 2 * f_pad), np.float64)
    w_inv[:, :nfreq] = icos_m
    w_inv[:, f_pad:f_pad + nfreq] = isin_m
    # TODO(synk): optionally cast operands to bfloat16 on v6e/v7x (keep
    # preferred_element_type=f32) for ~3x fewer MXU passes at ~1e-2 accuracy.
    return jnp.asarray(w_fwd, dtype), jnp.asarray(w_inv, dtype)


# ----------------------------------------------------------------------------
# Pass 1 kernel: per-lane k-th largest |rfft|^2 for one (column, row-tile) block.
# ----------------------------------------------------------------------------
def _kth_kernel(x_ref, wfwd_ref, kth_ref, *, f_pad, n_chan, rows_real, top_k, tile_r):
    r0 = pl.program_id(1) * tile_r                       # first global lane of tile
    x = x_ref[0].astype(jnp.float32)                     # [T, tile_r]
    z = jnp.dot(wfwd_ref[...], x, preferred_element_type=jnp.float32)   # [2Fp, R]
    xr = z[:f_pad]
    xi = z[f_pad:]
    freq2 = xr * xr + xi * xi                            # squared |rfft| (no sqrt)

    # torch: freq[0] = 0 zeroes BATCH element 0 -> flattened rows (lanes) [0, n_chan).
    glane = r0 + jax.lax.broadcasted_iota(jnp.int32, freq2.shape, 1)
    freq2 = jnp.where(glane < n_chan, 0.0, freq2)

    # Per-lane k-th largest with duplicates (== topk(freq, k).values.min() per row):
    # top_k iterations of (max, duplicate count, remove) -> O(k*F*R) VALU work
    # instead of the previous O(F^2*R) rank count.
    work = freq2
    removed = jnp.zeros((1, tile_r), jnp.float32)
    kth = jnp.zeros((1, tile_r), jnp.float32)
    for _ in range(top_k):                               # k is small and static
        m = jnp.max(work, axis=0, keepdims=True)
        cnt = jnp.sum((work >= m).astype(jnp.float32), axis=0, keepdims=True)
        hit = jnp.logical_and(removed < top_k, removed + cnt >= top_k)
        kth = jnp.where(hit, m, kth)
        removed = removed + cnt
        work = jnp.where(work >= m, -1.0, work)          # remove all copies of the max

    # Padded lanes must not influence the global min.
    glane1 = r0 + jax.lax.broadcasted_iota(jnp.int32, (1, tile_r), 1)
    kth = jnp.where(glane1 >= rows_real, jnp.inf, kth)
    kth_ref[0] = kth


# ----------------------------------------------------------------------------
# Pass 2 kernel: forward DFT -> mask with the per-column threshold -> inverse DFT.
# ----------------------------------------------------------------------------
def _apply_kernel(thr2_ref, x_ref, wfwd_ref, winv_ref, out_ref, *, f_pad, n_chan, tile_r):
    r0 = pl.program_id(1) * tile_r
    x = x_ref[0].astype(jnp.float32)                     # [T, tile_r]
    z = jnp.dot(wfwd_ref[...], x, preferred_element_type=jnp.float32)   # [2Fp, R]
    xr = z[:f_pad]
    xi = z[f_pad:]
    freq2 = xr * xr + xi * xi

    glane = r0 + jax.lax.broadcasted_iota(jnp.int32, freq2.shape, 1)
    freq2 = jnp.where(glane < n_chan, 0.0, freq2)        # torch: freq[0] = 0

    thr2 = thr2_ref[pl.program_id(0)]                    # per-column scalar (SMEM)
    keep = freq2 > thr2                                  # xf[freq <= thr] = 0
    zm = jnp.where(jnp.concatenate([keep, keep], axis=0), z, 0.0)
    y = jnp.dot(winv_ref[...], zm, preferred_element_type=jnp.float32)  # [T_out, R]
    out_ref[0] = y.astype(out_ref.dtype)


# ----------------------------------------------------------------------------
# Wrapper: two tiled pallas_calls per list element.
# ----------------------------------------------------------------------------
@functools.partial(jax.jit, static_argnames=("top_k",))
def _process_one(x, top_k):
    b, t, c, num_col = x.shape
    nfreq = t // 2 + 1
    assert nfreq >= top_k, "need at least top_k rfft bins (torch.topk requirement)"
    n_out = 2 * (nfreq - 1)
    f_pad = _round_up(nfreq, 8)               # 8-aligned bins -> cheap sublane slices
    rows = b * c
    r_pad = _round_up(rows, 128)              # lane-dense row axis (full 128-lane tiles)
    tile_r = 128
    for cand in (512, 256, 128):              # <= 512 lanes keeps the working set inside
        if r_pad % cand == 0:                 # the default scoped VMEM on v5e/v6e/v7x
            tile_r = cand
            break
    n_rt = r_pad // tile_r

    w_fwd, w_inv = _dft_matrices(t, f_pad)

    # [B, T, C, COL] -> [COL, T, B*C] (rows padded): time on sublanes, rows on lanes.
    x_t = jnp.transpose(x, (3, 1, 0, 2)).reshape(num_col, t, rows)
    if r_pad != rows:
        x_t = jnp.pad(x_t, ((0, 0), (0, 0), (0, r_pad - rows)))

    x_spec = pl.BlockSpec((1, t, tile_r), lambda col, r: (col, 0, r))
    # TODO(synk): the constant DFT matrices are double-buffered by the constant
    # index_map; single-buffer them via a scratch DMA if T becomes very large.
    wf_spec = pl.BlockSpec((2 * f_pad, t), lambda col, r: (0, 0))

    # Pass 1: per-lane k-th largest of |rfft|^2.
    kth = pl.pallas_call(
        functools.partial(_kth_kernel, f_pad=f_pad, n_chan=c, rows_real=rows,
                          top_k=top_k, tile_r=tile_r),
        out_shape=jax.ShapeDtypeStruct((num_col, 1, r_pad), jnp.float32),
        grid=(num_col, n_rt),
        in_specs=[x_spec, wf_spec],
        out_specs=pl.BlockSpec((1, 1, tile_r), lambda col, r: (col, 0, r)),
        compiler_params=pltpu.CompilerParams(
            dimension_semantics=("parallel", "parallel")),
    )(x_t, w_fwd)

    # Global threshold per column: min over every (b, c) row of its k-th largest
    # (squared-magnitude domain; squaring is monotone on |xf| >= 0).
    thr2 = jnp.min(kth[:, 0, :], axis=-1)                # (num_col,)

    # Pass 2: recompute DFT per row tile, mask with the scalar, inverse DFT.
    # TODO(synk): if the input DMA is exposed at large T, add
    # pipeline_mode=pl.Buffered(3) on x_spec.
    y = pl.pallas_call(
        functools.partial(_apply_kernel, f_pad=f_pad, n_chan=c, tile_r=tile_r),
        out_shape=jax.ShapeDtypeStruct((num_col, n_out, r_pad), x.dtype),
        grid=(num_col, n_rt),
        in_specs=[
            pl.BlockSpec(memory_space=pltpu.MemorySpace.SMEM),   # thr2 scalars
            x_spec,
            wf_spec,
            pl.BlockSpec((n_out, 2 * f_pad), lambda col, r: (0, 0)),
        ],
        out_specs=pl.BlockSpec((1, n_out, tile_r), lambda col, r: (col, 0, r)),
        compiler_params=pltpu.CompilerParams(
            dimension_semantics=("parallel", "parallel")),
    )(thr2, x_t, w_fwd, w_inv)

    # [COL, T_out, R_pad] -> [B, T_out, C, COL]  (== permute(0,2,1) + stack(dim=-1))
    y = y[:, :, :rows]
    return jnp.transpose(y.reshape(num_col, n_out, b, c), (2, 1, 3, 0))


def season_frequency_processor(time_images_season_list, top_k=5):
    return [_process_one(x, top_k=top_k) for x in time_images_season_list]


# ----------------------------------------------------------------------------
# Pure-JAX reference mirroring the PyTorch module
# ----------------------------------------------------------------------------
def _reference(time_images_season_list, top_k=5):
    outs = []
    for x in time_images_season_list:
        b, t, c, num_col = x.shape
        cols = []
        for col in range(num_col):
            xc = jnp.transpose(x[:, :, :, col], (0, 2, 1))      # [b, c, t]
            xf = jnp.fft.rfft(xc, axis=-1)
            freq = jnp.abs(xf)
            freq = freq.at[0].set(0.0)                          # torch: freq[0] = 0
            top_vals, _ = jax.lax.top_k(freq, top_k)
            thr = jnp.min(top_vals)
            xf = xf * (freq > thr)                              # xf[freq <= thr] = 0
            xs = jnp.fft.irfft(xf, axis=-1)
            cols.append(jnp.transpose(xs, (0, 2, 1)))
        outs.append(jnp.stack(cols, axis=-1))
    return outs


if __name__ == "__main__":
    key = jax.random.PRNGKey(0)
    b, c, num_col, top_k = 2, 4, 3, 5
    season_list = []
    for t in (16, 8):                 # two scales, like TimeMixer's multi-scale list
        key, sub = jax.random.split(key)
        season_list.append(jax.random.normal(sub, (b, t, c, num_col), jnp.float32))

    outs = season_frequency_processor(season_list, top_k=top_k)
    outs = [jax.block_until_ready(o) for o in outs]

    refs = _reference(season_list, top_k=top_k)
    for o, r in zip(outs, refs):
        assert o.shape == r.shape, (o.shape, r.shape)
        err = float(jnp.max(jnp.abs(o - r)))
        assert err < 1e-4, err

    print("KERNEL_OK")
</pallas_src>

<mosaic_0001>
module attributes {stable_mosaic.version = 11 : i64} {
  func.func @_kth_kernel(%arg0: i32, %arg1: i32, %arg2: memref<1x16x128xf32, #tpu.memory_space<vmem>>, %arg3: memref<32x16xf32, #tpu.memory_space<vmem>>, %arg4: memref<1x1x128xf32, #tpu.memory_space<vmem>>) attributes {dimension_semantics = [#tpu.dimension_semantics<parallel>, #tpu.dimension_semantics<parallel>], iteration_bounds = array<i64: 3, 1>, scalar_prefetch = 0 : i64, scratch_operands = 0 : i64, tpu.core_type = #tpu.core_type<tc>, window_params = [{transform_indices = @transform_0, window_bounds = array<i64: 1, 16, 128>}, {pipeline_mode = #tpu.pipeline_mode<synchronous>, transform_indices = @transform_1, window_bounds = array<i64: 32, 16>}, {transform_indices = @transform_2, window_bounds = array<i64: 1, 1, 128>}]} {
    %c128_i32 = arith.constant 128 : i32
    %0 = arith.muli %arg1, %c128_i32 : i32
    %c0 = arith.constant 0 : index
    %c0_0 = arith.constant 0 : index
    %c0_1 = arith.constant 0 : index
    %1 = vector.load %arg2[%c0, %c0_0, %c0_1] : memref<1x16x128xf32, #tpu.memory_space<vmem>>, vector<1x16x128xf32>
    %2 = vector.shape_cast %1 : vector<1x16x128xf32> to vector<16x128xf32>
    %c0_2 = arith.constant 0 : index
    %c0_3 = arith.constant 0 : index
    %3 = vector.load %arg3[%c0_2, %c0_3] : memref<32x16xf32, #tpu.memory_space<vmem>>, vector<32x16xf32>
    %cst = arith.constant dense<0.000000e+00> : vector<32x128xf32>
    %4 = tpu.matmul %3, %2, %cst {dimension_numbers = #tpu.dot_dimension_numbers<[1], [0], [0], [1], [0, 0, 1, 1], [], []>} : vector<32x16xf32>, vector<16x128xf32>, vector<32x128xf32> -> vector<32x128xf32>
    %5 = vector.extract_strided_slice %4 {offsets = [0, 0], sizes = [16, 128], strides = [1, 1]} : vector<32x128xf32> to vector<16x128xf32>
    %6 = vector.extract_strided_slice %4 {offsets = [16, 0], sizes = [16, 128], strides = [1, 1]} : vector<32x128xf32> to vector<16x128xf32>
    %7 = arith.mulf %5, %5 : vector<16x128xf32>
    %8 = arith.mulf %6, %6 : vector<16x128xf32>
    %9 = arith.addf %7, %8 : vector<16x128xf32>
    %10 = tpu.iota {dimensions = array<i32: 1>} : vector<16x128xi32>
    %11 = vector.broadcast %0 : i32 to vector<16x128xi32>
    %12 = arith.addi %11, %10 : vector<16x128xi32>
    %c4_i32 = arith.constant 4 : i32
    %13 = vector.broadcast %c4_i32 : i32 to vector<16x128xi32>
    %14 = arith.cmpi slt, %12, %13 : vector<16x128xi32>
    %cst_4 = arith.constant 0.000000e+00 : f32
    %15 = vector.broadcast %cst_4 : f32 to vector<16x128xf32>
    %16 = arith.select %14, %15, %9 : vector<16x128xi1>, vector<16x128xf32>
    %cst_5 = arith.constant 0.000000e+00 : f32
    %17 = vector.broadcast %cst_5 : f32 to vector<1x128xf32>
    %cst_6 = arith.constant 0.000000e+00 : f32
    %18 = vector.broadcast %cst_6 : f32 to vector<1x128xf32>
    %cst_7 = arith.constant dense<0xFF800000> : vector<128xf32>
    %19 = vector.multi_reduction <maximumf>, %16, %cst_7 [0] : vector<16x128xf32> to vector<128xf32>
    %20 = vector.shape_cast %19 : vector<128xf32> to vector<1x128xf32>
    %21 = vector.broadcast %20 : vector<1x128xf32> to vector<16x128xf32>
    %22 = arith.cmpf oge, %16, %21 : vector<16x128xf32>
    %23 = arith.extui %22 : vector<16x128xi1> to vector<16x128xi32>
    %24 = arith.sitofp %23 : vector<16x128xi32> to vector<16x128xf32>
    %cst_8 = arith.constant dense<0.000000e+00> : vector<128xf32>
    %25 = vector.multi_reduction <add>, %24, %cst_8 [0] : vector<16x128xf32> to vector<128xf32>
    %26 = vector.shape_cast %25 : vector<128xf32> to vector<1x128xf32>
    %cst_9 = arith.constant 5.000000e+00 : f32
    %27 = vector.broadcast %cst_9 : f32 to vector<1x128xf32>
    %28 = arith.cmpf olt, %17, %27 : vector<1x128xf32>
    %29 = arith.addf %17, %26 : vector<1x128xf32>
    %cst_10 = arith.constant 5.000000e+00 : f32
    %30 = vector.broadcast %cst_10 : f32 to vector<1x128xf32>
    %31 = arith.cmpf oge, %29, %30 : vector<1x128xf32>
    %32 = arith.andi %28, %31 : vector<1x128xi1>
    %33 = arith.select %32, %20, %18 : vector<1x128xi1>, vector<1x128xf32>
    %34 = arith.addf %17, %26 : vector<1x128xf32>
    %35 = vector.broadcast %20 : vector<1x128xf32> to vector<16x128xf32>
    %36 = arith.cmpf oge, %16, %35 : vector<16x128xf32>
    %cst_11 = arith.constant -1.000000e+00 : f32
    %37 = vector.broadcast %cst_11 : f32 to vector<16x128xf32>
    %38 = arith.select %36, %37, %16 : vector<16x128xi1>, vector<16x128xf32>
    %cst_12 = arith.constant dense<0xFF800000> : vector<128xf32>
    %39 = vector.multi_reduction <maximumf>, %38, %cst_12 [0] : vector<16x128xf32> to vector<128xf32>
    %40 = vector.shape_cast %39 : vector<128xf32> to vector<1x128xf32>
    %41 = vector.broadcast %40 : vector<1x128xf32> to vector<16x128xf32>
    %42 = arith.cmpf oge, %38, %41 : vector<16x128xf32>
    %43 = arith.extui %42 : vector<16x128xi1> to vector<16x128xi32>
    %44 = arith.sitofp %43 : vector<16x128xi32> to vector<16x128xf32>
    %cst_13 = arith.constant dense<0.000000e+00> : vector<128xf32>
    %45 = vector.multi_reduction <add>, %44, %cst_13 [0] : vector<16x128xf32> to vector<128xf32>
    %46 = vector.shape_cast %45 : vector<128xf32> to vector<1x128xf32>
    %cst_14 = arith.constant 5.000000e+00 : f32
    %47 = vector.broadcast %cst_14 : f32 to vector<1x128xf32>
    %48 = arith.cmpf olt, %34, %47 : vector<1x128xf32>
    %49 = arith.addf %34, %46 : vector<1x128xf32>
    %cst_15 = arith.constant 5.000000e+00 : f32
    %50 = vector.broadcast %cst_15 : f32 to vector<1x128xf32>
    %51 = arith.cmpf oge, %49, %50 : vector<1x128xf32>
    %52 = arith.andi %48, %51 : vector<1x128xi1>
    %53 = arith.select %52, %40, %33 : vector<1x128xi1>, vector<1x128xf32>
    %54 = arith.addf %34, %46 : vector<1x128xf32>
    %55 = vector.broadcast %40 : vector<1x128xf32> to vector<16x128xf32>
    %56 = arith.cmpf oge, %38, %55 : vector<16x128xf32>
    %cst_16 = arith.constant -1.000000e+00 : f32
    %57 = vector.broadcast %cst_16 : f32 to vector<16x128xf32>
    %58 = arith.select %56, %57, %38 : vector<16x128xi1>, vector<16x128xf32>
    %cst_17 = arith.constant dense<0xFF800000> : vector<128xf32>
    %59 = vector.multi_reduction <maximumf>, %58, %cst_17 [0] : vector<16x128xf32> to vector<128xf32>
    %60 = vector.shape_cast %59 : vector<128xf32> to vector<1x128xf32>
    %61 = vector.broadcast %60 : vector<1x128xf32> to vector<16x128xf32>
    %62 = arith.cmpf oge, %58, %61 : vector<16x128xf32>
    %63 = arith.extui %62 : vector<16x128xi1> to vector<16x128xi32>
    %64 = arith.sitofp %63 : vector<16x128xi32> to vector<16x128xf32>
    %cst_18 = arith.constant dense<0.000000e+00> : vector<128xf32>
    %65 = vector.multi_reduction <add>, %64, %cst_18 [0] : vector<16x128xf32> to vector<128xf32>
    %66 = vector.shape_cast %65 : vector<128xf32> to vector<1x128xf32>
    %cst_19 = arith.constant 5.000000e+00 : f32
    %67 = vector.broadcast %cst_19 : f32 to vector<1x128xf32>
    %68 = arith.cmpf olt, %54, %67 : vector<1x128xf32>
    %69 = arith.addf %54, %66 : vector<1x128xf32>
    %cst_20 = arith.constant 5.000000e+00 : f32
    %70 = vector.broadcast %cst_20 : f32 to vector<1x128xf32>
    %71 = arith.cmpf oge, %69, %70 : vector<1x128xf32>
    %72 = arith.andi %68, %71 : vector<1x128xi1>
    %73 = arith.select %72, %60, %53 : vector<1x128xi1>, vector<1x128xf32>
    %74 = arith.addf %54, %66 : vector<1x128xf32>
    %75 = vector.broadcast %60 : vector<1x128xf32> to vector<16x128xf32>
    %76 = arith.cmpf oge, %58, %75 : vector<16x128xf32>
    %cst_21 = arith.constant -1.000000e+00 : f32
    %77 = vector.broadcast %cst_21 : f32 to vector<16x128xf32>
    %78 = arith.select %76, %77, %58 : vector<16x128xi1>, vector<16x128xf32>
    %cst_22 = arith.constant dense<0xFF800000> : vector<128xf32>
    %79 = vector.multi_reduction <maximumf>, %78, %cst_22 [0] : vector<16x128xf32> to vector<128xf32>
    %80 = vector.shape_cast %79 : vector<128xf32> to vector<1x128xf32>
    %81 = vector.broadcast %80 : vector<1x128xf32> to vector<16x128xf32>
    %82 = arith.cmpf oge, %78, %81 : vector<16x128xf32>
    %83 = arith.extui %82 : vector<16x128xi1> to vector<16x128xi32>
    %84 = arith.sitofp %83 : vector<16x128xi32> to vector<16x128xf32>
    %cst_23 = arith.constant dense<0.000000e+00> : vector<128xf32>
    %85 = vector.multi_reduction <add>, %84, %cst_23 [0] : vector<16x128xf32> to vector<128xf32>
    %86 = vector.shape_cast %85 : vector<128xf32> to vector<1x128xf32>
    %cst_24 = arith.constant 5.000000e+00 : f32
    %87 = vector.broadcast %cst_24 : f32 to vector<1x128xf32>
    %88 = arith.cmpf olt, %74, %87 : vector<1x128xf32>
    %89 = arith.addf %74, %86 : vector<1x128xf32>
    %cst_25 = arith.constant 5.000000e+00 : f32
    %90 = vector.broadcast %cst_25 : f32 to vector<1x128xf32>
    %91 = arith.cmpf oge, %89, %90 : vector<1x128xf32>
    %92 = arith.andi %88, %91 : vector<1x128xi1>
    %93 = arith.select %92, %80, %73 : vector<1x128xi1>, vector<1x128xf32>
    %94 = arith.addf %74, %86 : vector<1x128xf32>
    %95 = vector.broadcast %80 : vector<1x128xf32> to vector<16x128xf32>
    %96 = arith.cmpf oge, %78, %95 : vector<16x128xf32>
    %cst_26 = arith.constant -1.000000e+00 : f32
    %97 = vector.broadcast %cst_26 : f32 to vector<16x128xf32>
    %98 = arith.select %96, %97, %78 : vector<16x128xi1>, vector<16x128xf32>
    %cst_27 = arith.constant dense<0xFF800000> : vector<128xf32>
    %99 = vector.multi_reduction <maximumf>, %98, %cst_27 [0] : vector<16x128xf32> to vector<128xf32>
    %100 = vector.shape_cast %99 : vector<128xf32> to vector<1x128xf32>
    %101 = vector.broadcast %100 : vector<1x128xf32> to vector<16x128xf32>
    %102 = arith.cmpf oge, %98, %101 : vector<16x128xf32>
    %103 = arith.extui %102 : vector<16x128xi1> to vector<16x128xi32>
    %104 = arith.sitofp %103 : vector<16x128xi32> to vector<16x128xf32>
    %cst_28 = arith.constant dense<0.000000e+00> : vector<128xf32>
    %105 = vector.multi_reduction <add>, %104, %cst_28 [0] : vector<16x128xf32> to vector<128xf32>
    %106 = vector.shape_cast %105 : vector<128xf32> to vector<1x128xf32>
    %cst_29 = arith.constant 5.000000e+00 : f32
    %107 = vector.broadcast %cst_29 : f32 to vector<1x128xf32>
    %108 = arith.cmpf olt, %94, %107 : vector<1x128xf32>
    %109 = arith.addf %94, %106 : vector<1x128xf32>
    %cst_30 = arith.constant 5.000000e+00 : f32
    %110 = vector.broadcast %cst_30 : f32 to vector<1x128xf32>
    %111 = arith.cmpf oge, %109, %110 : vector<1x128xf32>
    %112 = arith.andi %108, %111 : vector<1x128xi1>
    %113 = arith.select %112, %100, %93 : vector<1x128xi1>, vector<1x128xf32>
    %114 = tpu.iota {dimensions = array<i32: 1>} : vector<1x128xi32>
    %115 = vector.broadcast %0 : i32 to vector<1x128xi32>
    %116 = arith.addi %115, %114 : vector<1x128xi32>
    %c8_i32 = arith.constant 8 : i32
    %117 = vector.broadcast %c8_i32 : i32 to vector<1x128xi32>
    %118 = arith.cmpi sge, %116, %117 : vector<1x128xi32>
    %cst_31 = arith.constant 0x7F800000 : f32
    %119 = vector.broadcast %cst_31 : f32 to vector<1x128xf32>
    %120 = arith.select %118, %119, %113 : vector<1x128xi1>, vector<1x128xf32>
    %c0_32 = arith.constant 0 : index
    %c0_33 = arith.constant 0 : index
    %c0_34 = arith.constant 0 : index
    %121 = vector.load %arg4[%c0_32, %c0_33, %c0_34] : memref<1x1x128xf32, #tpu.memory_space<vmem>>, vector<1x1x128xf32>
    %122 = vector.shape_cast %121 : vector<1x1x128xf32> to vector<1x128xf32>
    %123 = vector.shape_cast %120 : vector<1x128xf32> to vector<1x1x128xf32>
    tpu.vector_store %arg4[%c0_32, %c0_33, %c0_34], %123 {strides = array<i32>} : memref<1x1x128xf32, #tpu.memory_space<vmem>>, vector<1x1x128xf32>,
    return
  }
  func.func @transform_0(%arg0: i32, %arg1: i32) -> (i32, i32, i32) {
    %c0_i32 = arith.constant 0 : i32
    %c0_i32_0 = arith.constant 0 : i32
    return %arg0, %c0_i32, %arg1 : i32, i32, i32
  }
  func.func @transform_1(%arg0: i32, %arg1: i32) -> (i32, i32) {
    %c0_i32 = arith.constant 0 : i32
    %c0_i32_0 = arith.constant 0 : i32
    %c0_i32_1 = arith.constant 0 : i32
    return %c0_i32, %c0_i32_0 : i32, i32
  }
  func.func @transform_2(%arg0: i32, %arg1: i32) -> (i32, i32, i32) {
    %c0_i32 = arith.constant 0 : i32
    %c0_i32_0 = arith.constant 0 : i32
    return %arg0, %c0_i32, %arg1 : i32, i32, i32
  }
}

module attributes {stable_mosaic.version = 11 : i64} {
  func.func @_apply_kernel(%arg0: i32, %arg1: i32, %arg2: memref<3xf32, #tpu.memory_space<smem>>, %arg3: memref<1x16x128xf32, #tpu.memory_space<vmem>>, %arg4: memref<32x16xf32, #tpu.memory_space<vmem>>, %arg5: memref<16x32xf32, #tpu.memory_space<vmem>>, %arg6: memref<1x16x128xf32, #tpu.memory_space<vmem>>) attributes {dimension_semantics = [#tpu.dimension_semantics<parallel>, #tpu.dimension_semantics<parallel>], iteration_bounds = array<i64: 3, 1>, scalar_prefetch = 0 : i64, scratch_operands = 0 : i64, tpu.core_type = #tpu.core_type<tc>, window_params = [{transform_indices = @transform_0, window_bounds = array<i64: 3>}, {transform_indices = @transform_1, window_bounds = array<i64: 1, 16, 128>}, {pipeline_mode = #tpu.pipeline_mode<synchronous>, transform_indices = @transform_2, window_bounds = array<i64: 32, 16>}, {pipeline_mode = #tpu.pipeline_mode<synchronous>, transform_indices = @transform_3, window_bounds = array<i64: 16, 32>}, {transform_indices = @transform_4, window_bounds = array<i64: 1, 16, 128>}]} {
    %c128_i32 = arith.constant 128 : i32
    %0 = arith.muli %arg1, %c128_i32 : i32
    %c0 = arith.constant 0 : index
    %c0_0 = arith.constant 0 : index
    %c0_1 = arith.constant 0 : index
    %1 = vector.load %arg3[%c0, %c0_0, %c0_1] : memref<1x16x128xf32, #tpu.memory_space<vmem>>, vector<1x16x128xf32>
    %2 = vector.shape_cast %1 : vector<1x16x128xf32> to vector<16x128xf32>
    %c0_2 = arith.constant 0 : index
    %c0_3 = arith.constant 0 : index
    %3 = vector.load %arg4[%c0_2, %c0_3] : memref<32x16xf32, #tpu.memory_space<vmem>>, vector<32x16xf32>
    %cst = arith.constant dense<0.000000e+00> : vector<32x128xf32>
    %4 = tpu.matmul %3, %2, %cst {dimension_numbers = #tpu.dot_dimension_numbers<[1], [0], [0], [1], [0, 0, 1, 1], [], []>} : vector<32x16xf32>, vector<16x128xf32>, vector<32x128xf32> -> vector<32x128xf32>
    %5 = vector.extract_strided_slice %4 {offsets = [0, 0], sizes = [16, 128], strides = [1, 1]} : vector<32x128xf32> to vector<16x128xf32>
    %6 = vector.extract_strided_slice %4 {offsets = [16, 0], sizes = [16, 128], strides = [1, 1]} : vector<32x128xf32> to vector<16x128xf32>
    %7 = arith.mulf %5, %5 : vector<16x128xf32>
    %8 = arith.mulf %6, %6 : vector<16x128xf32>
    %9 = arith.addf %7, %8 : vector<16x128xf32>
    %10 = tpu.iota {dimensions = array<i32: 1>} : vector<16x128xi32>
    %11 = vector.broadcast %0 : i32 to vector<16x128xi32>
    %12 = arith.addi %11, %10 : vector<16x128xi32>
    %c4_i32 = arith.constant 4 : i32
    %13 = vector.broadcast %c4_i32 : i32 to vector<16x128xi32>
    %14 = arith.cmpi slt, %12, %13 : vector<16x128xi32>
    %cst_4 = arith.constant 0.000000e+00 : f32
    %15 = vector.broadcast %cst_4 : f32 to vector<16x128xf32>
    %16 = arith.select %14, %15, %9 : vector<16x128xi1>, vector<16x128xf32>
    %17 = arith.index_cast %arg0 : i32 to index
    %18 = memref.load %arg2[%17] : memref<3xf32, #tpu.memory_space<smem>>
    %19 = vector.broadcast %18 : f32 to vector<16x128xf32>
    %20 = arith.cmpf ogt, %16, %19 : vector<16x128xf32>
    %21 = tpu.concatenate %20, %20 in 0 : vector<16x128xi1>, vector<16x128xi1> -> vector<32x128xi1>
    %cst_5 = arith.constant 0.000000e+00 : f32
    %22 = vector.broadcast %cst_5 : f32 to vector<32x128xf32>
    %23 = arith.select %21, %4, %22 : vector<32x128xi1>, vector<32x128xf32>
    %c0_6 = arith.constant 0 : index
    %c0_7 = arith.constant 0 : index
    %24 = vector.load %arg5[%c0_6, %c0_7] : memref<16x32xf32, #tpu.memory_space<vmem>>, vector<16x32xf32>
    %cst_8 = arith.constant dense<0.000000e+00> : vector<16x128xf32>
    %25 = tpu.matmul %24, %23, %cst_8 {dimension_numbers = #tpu.dot_dimension_numbers<[1], [0], [0], [1], [0, 0, 1, 1], [], []>} : vector<16x32xf32>, vector<32x128xf32>, vector<16x128xf32> -> vector<16x128xf32>
    %c0_9 = arith.constant 0 : index
    %c0_10 = arith.constant 0 : index
    %c0_11 = arith.constant 0 : index
    %26 = vector.load %arg6[%c0_9, %c0_10, %c0_11] : memref<1x16x128xf32, #tpu.memory_space<vmem>>, vector<1x16x128xf32>
    %27 = vector.shape_cast %26 : vector<1x16x128xf32> to vector<16x128xf32>
    %28 = vector.shape_cast %25 : vector<16x128xf32> to vector<1x16x128xf32>
    tpu.vector_store %arg6[%c0_9, %c0_10, %c0_11], %28 {strides = array<i32>} : memref<1x16x128xf32, #tpu.memory_space<vmem>>, vector<1x16x128xf32>,
    return
  }
  func.func @transform_0(%arg0: i32, %arg1: i32) -> i32 {
    %c0_i32 = arith.constant 0 : i32
    %c0_i32_0 = arith.constant 0 : i32
    return %c0_i32 : i32
  }
  func.func @transform_1(%arg0: i32, %arg1: i32) -> (i32, i32, i32) {
    %c0_i32 = arith.constant 0 : i32
    %c0_i32_0 = arith.constant 0 : i32
    return %arg0, %c0_i32, %arg1 : i32, i32, i32
  }
  func.func @transform_2(%arg0: i32, %arg1: i32) -> (i32, i32) {
    %c0_i32 = arith.constant 0 : i32
    %c0_i32_0 = arith.constant 0 : i32
    %c0_i32_1 = arith.constant 0 : i32
    return %c0_i32, %c0_i32_0 : i32, i32
  }
  func.func @transform_3(%arg0: i32, %arg1: i32) -> (i32, i32) {
    %c0_i32 = arith.constant 0 : i32
    %c0_i32_0 = arith.constant 0 : i32
    %c0_i32_1 = arith.constant 0 : i32
    return %c0_i32, %c0_i32_0 : i32, i32
  }
  func.func @transform_4(%arg0: i32, %arg1: i32) -> (i32, i32, i32) {
    %c0_i32 = arith.constant 0 : i32
    %c0_i32_0 = arith.constant 0 : i32
    return %arg0, %c0_i32, %arg1 : i32, i32, i32
  }
}

</mosaic_0001>

<bundles_post_ra>
// kernel: _process_one.2
= control target key start
LH: loop header
LB: loop body
LE: loop exit
PB: predicated region body
PF: predicated region fallthrough
CT: control target
= control target key end

     0   :  { %s607_s9 = smov 0   ;;  %s609_s10 = smov 0   ;;  %s686_s0 = inlined_call_operand.vmem [shape: f32[3,16,128], index: 0, kind: input, shape index: {}]   ;;  %s687_s1 = inlined_call_operand.vmem [shape: f32[32,16], index: 1, kind: input, shape index: {}]   ;;  %s688_s2 = inlined_call_operand.vmem [shape: f32[3,1,128], index: 2, kind: output, shape index: {}]  }
   0x1   :  { %s611_s11 = smov 0  }
   0x2 LB: > { %s24_s12 = sadd.s32 1, %s585_s10  ;;  %p500_p0 = scmp.ge.s32.totalorder %s589_s11, 1  ;;  %s589_s11 = sphi %s611_s11, %s12_s11   ;;  %s585_s10 = sphi %s609_s10, %s694_s10   ;;  %s581_s9 = sphi %s607_s9, %s693_s9  }
   0x3   : > { %p26_p1 = scmp.ge.s32.totalorder %s24_s12, 3  ;;  %p131_p2 = scmp.lt.s32.totalorder %s589_s11, 4 }
   0x5   : > { %s696_s12 = smov (%p26_p1, %s24_s12), 0  ;;  %p132_p3 = pnand %p500_p0, %p131_p2 }
   0x6   : > { %p157_p4 = scmp.lt.s32.totalorder (!%p132_p3), %s581_s9, 2  ;;  %v174_v0 = vld [vmem:[%s687_s1] sm:$0xff] (!%p132_p3)  ;;  %vm178_vm0 = vcmask (!%p132_p3), 130048   ;;  %v176_v1 = vld [vmem:[%s687_s1 + $0x10] sm:$0xff] (!%p132_p3)  ;;  %v175_v5 = vld [vmem:[%s687_s1 + $0x8] sm:$0xff] (!%p132_p3)  ;;  %v282_v7 = vlaneseq (!%p132_p3)  ;;  %v591_v28 = vmov (!%p132_p3), 0.0  }
   0x7   : > { %135 = sbr.rel (%p132_p3) target bundleno = 346 (0x15a), region = 28  ;;  %530 = vmatprep.mubr.msk.f32.mxu0 (!%p132_p3), %vm178_vm0, %v174_v0  ;;  %533 = vmatprep.mubr.msk.f32.mxu1 (!%p132_p3), %vm178_vm0, %v176_v1  ;;  %v177_v6 = vld [vmem:[%s687_s1 + $0x18] sm:$0xff] (!%p132_p3) }
   0x8   : > { %v647_v8 = vand.u32 (!%p132_p3), 127, %v282_v7 }
   0xa   : > { %vm286_vm1 = vcmp.lt.s32.totalorder (!%p132_p3), %v647_v8, 4 }
   0xe   : > { %s698_s9 = smov (!%p157_p4, %s581_s9), 2 }
   0xf   : > { %s519_s17 = sshll.u32 %s698_s9, 4  ;;  %s170_s27 = scalar_lea.vmem %s688_s2, %s698_s9 }
  0x10   : > { %s164_s20 = scalar_lea.vmem %s686_s0, %s519_s17 }
  0x11   : > { %v172_v2 = vld [vmem:[%s164_s20] sm:$0xff]  ;;  %v173_v3 = vld [vmem:[%s164_s20 + $0x8] sm:$0xff] }
  0x12   : > { %v536_v4 = vpack.c.bf16 %v173_v3, %v172_v2 }
  0x14   : > { %537 = vmatprep.subr.bf16.mxu0 %v536_v4  ;;  %540 = vmatprep.subr.bf16.mxu1 %v536_v4 }
  0x15   : > { %539 = vmatpush3.bf16.msra.mxu0 %v536_v4  ;;  %541 = vmatpush3.bf16.msra.mxu1 %v536_v4 }
  0x18   : > { %531 = vmatmul.mubr.msk.f32.vlgmr.msra.gmra.mrb[0].mxu0 %vm178_vm0, %v175_v5  ;;  %534 = vmatmul.mubr.msk.f32.vlgmr.msra.gmra.mrb[0].mxu1 %vm178_vm0, %v177_v6 }
  0xeb   : > { %v532_v9 = vpop.f32.mrb[0].mxu0  ;;  %v535_v10 = vpop.f32.mrb[0].mxu1 }
  0xec   : > { %v277_v11 = vmul.f32 %v532_v9, %v532_v9  ;;  %v279_v12 = vmul.f32 %v535_v10, %v535_v10  ;;  %v257_v13 = vpop.f32.mrb[1].mxu0  ;;  %v267_v14 = vpop.f32.mrb[1].mxu1 }
  0xed   : > { %v276_v15 = vmul.f32 %v257_v13, %v257_v13  ;;  %v278_v16 = vmul.f32 %v267_v14, %v267_v14 }
  0xee   : > { %v281_v17 = vadd.f32 %v279_v12, %v277_v11 }
  0xef   : > { %v280_v18 = vadd.f32 %v278_v16, %v276_v15 }
  0xf0   : > { %v288_v19 = vsel %vm286_vm1, 0.0, %v281_v17 }
  0xf1   : > { %v287_v20 = vsel %vm286_vm1, 0.0, %v280_v18 }
  0xf2   : > { %v289_v21 = vmax.f32 %v287_v20, %v288_v19 }
  0xf4   : > { %v290_v22 = vrot.slane %v289_v21, 4 }
  0xf6   : > { %v291_v23 = vmax.f32 %v289_v21, %v290_v22 }
  0xf8   : > { %v292_v24 = vrot.slane %v291_v23, 2 }
  0xfa   : > { %v293_v25 = vmax.f32 %v291_v23, %v292_v24 }
  0xfc   : > { %v294_v26 = vrot.slane %v293_v25, 1 }
  0xfe   : > { %v295_v27 = vmax.f32 %v293_v25, %v294_v26 }
 0x100   : > { %vm296_vm2 = vcmp.ge.f32.partialorder %v287_v20, %v295_v27  ;;  %vm297_vm3 = vcmp.ge.f32.partialorder %v288_v19, %v295_v27 }
 0x101   : > { %v507_v29 = vsel %vm296_vm2, 1.0, %v591_v28  ;;  %v508_v30 = vsel %vm297_vm3, 1.0, %v591_v28  ;;  %v314_v31 = vsel %vm296_vm2, -1.0, %v287_v20  ;;  %v315_v32 = vsel %vm297_vm3, -1.0, %v288_v19 }
 0x102   : > { %v302_v33 = vadd.f32 %v508_v30, %v507_v29  ;;  %v316_v34 = vmax.f32 %v314_v31, %v315_v32 }
 0x104   : > { %v303_v35 = vrot.slane %v302_v33, 4  ;;  %v317_v36 = vrot.slane %v316_v34, 4 }
 0x106   : > { %v304_v37 = vadd.f32 %v303_v35, %v302_v33  ;;  %v318_v38 = vmax.f32 %v316_v34, %v317_v36 }
 0x108   : > { %v305_v39 = vrot.slane %v304_v37, 2  ;;  %v319_v40 = vrot.slane %v318_v38, 2 }
 0x10a   : > { %v306_v41 = vadd.f32 %v305_v39, %v304_v37  ;;  %v320_v42 = vmax.f32 %v318_v38, %v319_v40 }
 0x10c   : > { %v307_v43 = vrot.slane %v306_v41, 1  ;;  %v321_v44 = vrot.slane %v320_v42, 1 }
 0x10e   : > { %v308_v45 = vadd.f32 %v307_v43, %v306_v41  ;;  %v322_v46 = vmax.f32 %v320_v42, %v321_v44 }
 0x110   : > { %vm311_vm4 = vcmp.ge.f32.partialorder %v308_v45, 5.0  ;;  %vm323_vm5 = vcmp.ge.f32.partialorder %v314_v31, %v322_v46  ;;  %vm324_vm6 = vcmp.ge.f32.partialorder %v315_v32, %v322_v46  ;;  %vm336_vm9 = vcmp.lt.f32.partialorder %v308_v45, 5.0 }
 0x111   : > { %v313_v47 = vsel %vm311_vm4, %v295_v27, 0.0  ;;  %v509_v48 = vsel %vm323_vm5, 1.0, %v591_v28  ;;  %v510_v49 = vsel %vm324_vm6, 1.0, %v591_v28  ;;  %v341_v50 = vsel %vm323_vm5, -1.0, %v314_v31 }
 0x112   : > { %v329_v51 = vadd.f32 %v510_v49, %v509_v48  ;;  %v342_v52 = vsel %vm324_vm6, -1.0, %v315_v32  ;;  %vm422_vm6 = vcmp.ge.s32.totalorder %v647_v8, 8 }
 0x113   : > { %v343_v53 = vmax.f32 %v341_v50, %v342_v52 }
 0x114   : > { %v330_v54 = vrot.slane %v329_v51, 4 }
 0x115   : > { %v344_v55 = vrot.slane %v343_v53, 4 }
 0x116   : > { %v331_v56 = vadd.f32 %v330_v54, %v329_v51 }
 0x117   : > { %v345_v57 = vmax.f32 %v343_v53, %v344_v55 }
 0x118   : > { %v332_v58 = vrot.slane %v331_v56, 2 }
 0x119   : > { %v346_v59 = vrot.slane %v345_v57, 2 }
 0x11a   : > { %v333_v60 = vadd.f32 %v332_v58, %v331_v56 }
 0x11b   : > { %v347_v61 = vmax.f32 %v345_v57, %v346_v59 }
 0x11c   : > { %v334_v62 = vrot.slane %v333_v60, 1 }
 0x11d   : > { %v348_v63 = vrot.slane %v347_v61, 1 }
 0x11e   : > { %v335_v0 = vadd.f32 %v334_v62, %v333_v60 }
 0x11f   : > { %v349_v1 = vmax.f32 %v347_v61, %v348_v63 }
 0x120   : > { %v337_v2 = vadd.f32 %v335_v0, %v308_v45 }
 0x121   : > { %vm350_vm7 = vcmp.ge.f32.partialorder %v341_v50, %v349_v1  ;;  %vm351_vm8 = vcmp.ge.f32.partialorder %v342_v52, %v349_v1 }
 0x122   : > { %vm338_vm10 = vcmp.ge.f32.partialorder %v337_v2, 5.0  ;;  %v511_v3 = vsel %vm350_vm7, 1.0, %v591_v28  ;;  %v512_v4 = vsel %vm351_vm8, 1.0, %v591_v28  ;;  %v368_v7 = vsel %vm350_vm7, -1.0, %v341_v50 }
 0x123   : > { %vm656_vm11 = vmand %vm336_vm9, %vm338_vm10  ;;  %v356_v6 = vadd.f32 %v512_v4, %v511_v3  ;;  %v369_v9 = vsel %vm351_vm8, -1.0, %v342_v52  ;;  %vm363_vm14 = vcmp.lt.f32.partialorder %v337_v2, 5.0 }
 0x124   : > { %v340_v10 = vsel %vm656_vm11, %v322_v46, %v313_v47  ;;  %v370_v11 = vmax.f32 %v368_v7, %v369_v9 }
 0x125   : > { %v357_v12 = vrot.slane %v356_v6, 4 }
 0x126   : > { %v371_v13 = vrot.slane %v370_v11, 4 }
 0x127   : > { %v358_v14 = vadd.f32 %v357_v12, %v356_v6 }
 0x128   : > { %v372_v15 = vmax.f32 %v370_v11, %v371_v13 }
 0x129   : > { %v359_v16 = vrot.slane %v358_v14, 2 }
 0x12a   : > { %v373_v17 = vrot.slane %v372_v15, 2 }
 0x12b   : > { %v360_v18 = vadd.f32 %v359_v16, %v358_v14 }
 0x12c   : > { %v374_v19 = vmax.f32 %v372_v15, %v373_v17 }
 0x12d   : > { %v361_v20 = vrot.slane %v360_v18, 1 }
 0x12e   : > { %v375_v21 = vrot.slane %v374_v19, 1 }
 0x12f   : > { %v362_v22 = vadd.f32 %v361_v20, %v360_v18 }
 0x130   : > { %v376_v23 = vmax.f32 %v374_v19, %v375_v21 }
 0x131   : > { %v364_v24 = vadd.f32 %v362_v22, %v337_v2 }
 0x132   : > { %vm377_vm12 = vcmp.ge.f32.partialorder %v368_v7, %v376_v23  ;;  %vm378_vm13 = vcmp.ge.f32.partialorder %v369_v9, %v376_v23 }
 0x133   : > { %vm365_vm15 = vcmp.ge.f32.partialorder %v364_v24, 5.0  ;;  %v513_v25 = vsel %vm377_vm12, 1.0, %v591_v28  ;;  %v514_v26 = vsel %vm378_vm13, 1.0, %v591_v28  ;;  %v395_v29 = vsel %vm377_vm12, -1.0, %v368_v7 }
 0x134   : > { %vm366_vm0 = vmand %vm363_vm14, %vm365_vm15  ;;  %v383_v27 = vadd.f32 %v514_v26, %v513_v25  ;;  %v396_v30 = vsel %vm378_vm13, -1.0, %v369_v9  ;;  %vm390_vm3 = vcmp.lt.f32.partialorder %v364_v24, 5.0 }
 0x135   : > { %v367_v31 = vsel %vm366_vm0, %v349_v1, %v340_v10  ;;  %v397_v32 = vmax.f32 %v395_v29, %v396_v30 }
 0x136   : > { %v384_v33 = vrot.slane %v383_v27, 4 }
 0x137   : > { %v398_v34 = vrot.slane %v397_v32, 4 }
 0x138   : > { %v385_v35 = vadd.f32 %v384_v33, %v383_v27 }
 0x139   : > { %v399_v36 = vmax.f32 %v397_v32, %v398_v34 }
 0x13a   : > { %v386_v37 = vrot.slane %v385_v35, 2 }
 0x13b   : > { %v400_v38 = vrot.slane %v399_v36, 2 }
 0x13c   : > { %v387_v39 = vadd.f32 %v386_v37, %v385_v35 }
 0x13d   : > { %v401_v40 = vmax.f32 %v399_v36, %v400_v38 }
 0x13e   : > { %v388_v41 = vrot.slane %v387_v39, 1 }
 0x13f   : > { %v402_v42 = vrot.slane %v401_v40, 1 }
 0x140   : > { %v389_v43 = vadd.f32 %v388_v41, %v387_v39 }
 0x141   : > { %v403_v44 = vmax.f32 %v401_v40, %v402_v42 }
 0x142   : > { %v391_v45 = vadd.f32 %v389_v43, %v364_v24 }
 0x143   : > { %vm404_vm1 = vcmp.ge.f32.partialorder %v395_v29, %v403_v44  ;;  %vm405_vm2 = vcmp.ge.f32.partialorder %v396_v30, %v403_v44 }
 0x144   : > { %vm392_vm4 = vcmp.ge.f32.partialorder %v391_v45, 5.0  ;;  %v515_v46 = vsel %vm404_vm1, 1.0, %v591_v28  ;;  %v516_v47 = vsel %vm405_vm2, 1.0, %v591_v28  ;;  %vm417_vm7 = vcmp.lt.f32.partialorder %v391_v45, 5.0 }
 0x145   : > { %vm666_vm5 = vmand %vm390_vm3, %vm392_vm4  ;;  %v410_v49 = vadd.f32 %v516_v47, %v515_v46 }
 0x146   : > { %v394_v50 = vsel %vm666_vm5, %v376_v23, %v367_v31 }
 0x147   : > { %v411_v51 = vrot.slane %v410_v49, 4 }
 0x149   : > { %v412_v52 = vadd.f32 %v411_v51, %v410_v49 }
 0x14b   : > { %v413_v53 = vrot.slane %v412_v52, 2 }
 0x14d   : > { %v414_v54 = vadd.f32 %v413_v53, %v412_v52 }
 0x14f   : > { %v415_v55 = vrot.slane %v414_v54, 1 }
 0x151   : > { %v416_v56 = vadd.f32 %v415_v55, %v414_v54 }
 0x153   : > { %v418_v57 = vadd.f32 %v416_v56, %v391_v45 }
 0x155   : > { %vm419_vm8 = vcmp.ge.f32.partialorder %v418_v57, 5.0 }
 0x156   : > { %vm420_vm9 = vmand %vm417_vm7, %vm419_vm8 }
 0x157   : > { %v421_v28 = vsel %vm420_vm9, %v403_v44, %v394_v50 }
 0x158   : > { %v423_v58 = vsel %vm422_vm6, inf, %v421_v28 }
 0x159   : > { %424 = vst [vmem:[%s170_s27] sm:$0x1] %v423_v58 }
 0x15a PF: > { %s12_s11 = sadd.s32 1, %s589_s11   ;;  %s693_s9 = smov %s585_s10 }
 0x15b   : > { %p9_p5 = scmp.ge.s32.totalorder %s12_s11, 5   ;;  %s694_s10 = smov %s696_s12 }
 0x15d   :  { %11 = sbr.rel (!%p9_p5) target bundleno = 2 (0x2), region = 58 }

// kernel: _process_one.3
= control target key start
LH: loop header
LB: loop body
LE: loop exit
PB: predicated region body
PF: predicated region fallthrough
CT: control target
= control target key end

     0   :  { %9 = vsyncpa [#allocation3], 0  ;;  %s729_s15 = smov 0   ;;  %s731_s16 = smov 0   ;;  %s816_s0 = inlined_call_operand.vmem [shape: f32[3], index: 0, kind: input, shape index: {}]   ;;  %s817_s1 = inlined_call_operand.vmem [shape: f32[3,16,128], index: 1, kind: input, shape index: {}]   ;;  %s818_s2 = inlined_call_operand.vmem [shape: f32[32,16], index: 2, kind: input, shape index: {}]   ;;  %s819_s3 = inlined_call_operand.vmem [shape: f32[16,32], index: 3, kind: input, shape index: {}]   ;;  %s820_s4 = inlined_call_operand.vmem [shape: f32[3,16,128], index: 4, kind: output, shape index: {}]  }
   0x1   :  { %s733_s17 = smov 0  }
   0x2 LB: > { %s551_s18 = sadd.s32 4294967295, %s701_s17   ;;  %s27_s19 = sadd.s32 1, %s697_s16  ;;  %s701_s17 = sphi %s733_s17, %s15_s17   ;;  %s697_s16 = sphi %s731_s16, %s824_s16   ;;  %s693_s15 = sphi %s729_s15, %s823_s15  }
   0x3   : > { %p29_p0 = scmp.ge.s32.totalorder %s27_s19, 3  ;;  %p553_p1 = scmp.ge.s32.totalorder %s701_s17, 1 }
   0x4   : > { %p151_p2 = scmp.lt.s32.totalorder %s701_s17, 4  ;;  %p754_p4 = scmp.eq.s32.totalorder %s551_s18, 0 }
   0x5   : > { %s826_s19 = smov (%p29_p0, %s27_s19), 0  ;;  %s164_s24 = sshll.u32 %s816_s0, 4  ;;  %s165_s24 = int_to_ptr.vmem [resolvable:$true] %s164_s24 }
   0x6   : > { %p750_p3 = pnand %p553_p1, %p151_p2  ;;  %s660_s25 = scalar_lea.vmem %s165_s24, 16 }
   0x7   : > { %p661_p7 = scmp.ne.s32.totalorder %s165_s24, %s660_s25  ;;  %p668_p11 = scmp.lt.s32.totalorder %s165_s24, %s165_s24 }
   0x8   : > { %p629_p5 = pneg %p750_p3  ;;  %p669_p12 = scmp.lt.s32.totalorder %s660_s25, %s660_s25 }
   0xa   : > { %p630_p6 = pnand %p754_p4, %p629_p5  ;;  %p670_p13 = por %p669_p12, %p668_p11 }
   0xc   : > { %p662_p8 = pneg %p630_p6 }
   0xe   : > { %p663_p9 = pnand %p662_p8, %p661_p7 }
  0x10   : > { %p664_p10 = pneg %p663_p9 }
  0x12   : > { %p671_p0 = pnand %p670_p13, %p664_p10 }
  0x14   : > { %674 = shalt.err (!%p671_p0)
}
  0x15   : > { %s703_s26 = smov [#allocation2]   ;;  %194 = sbr.rel (%p750_p3) target bundleno = 490 (0x1ea), region = 36 }
  0x16   : > { %632 = dma.vmem_to_smem (!%p630_p6), %s165_s24, 16, %s703_s26, [#allocation3]  }
  0x1c   : > { %688 = dma.done.wait (%p754_p4), [#allocation3], 16  }
  0x1d   : > { %690 = vsyncadd (%p754_p4), [#allocation3], 4294967280 }
  0x1e   : > { %200 = sfence }
  0x1f   : > { %p227_p1 = scmp.lt.s32.totalorder %s693_s15, 2  ;;  %v246_v0 = vld [vmem:[%s818_s2] sm:$0xff]  ;;  %vm250_vm0 = vcmask 130048   ;;  %v247_v4 = vld [vmem:[%s818_s2 + $0x8] sm:$0xff]  ;;  %v248_v5 = vld [vmem:[%s818_s2 + $0x10] sm:$0xff]  ;;  %vm371_vm1 = vcmask 261120   ;;  %v354_v8 = vlaneseq }
  0x20   : > { %592 = vmatprep.mubr.msk.f32.mxu0 %vm250_vm0, %v246_v0  ;;  %v249_v6 = vld [vmem:[%s818_s2 + $0x18] sm:$0xff]  ;;  %v369_v7 = vld [vmem:[%s819_s3] sm:$0xff]  ;;  %s361_s20 = sld [smem:[#allocation2 + %s693_s15]]  ;;  %v370_v25 = vld [vmem:[%s819_s3 + $0x8] sm:$0xff] }
  0x21   : > { %s776_s29 = scalar_select %p227_p1, %s693_s15, 2  ;;  %606 = vmatprep.mubr.msk.f32.mxu1 %vm371_vm1, %v369_v7  ;;  %v355_v11 = vand.u32 127, %v354_v8 }
  0x23   : > { %s574_s30 = sshll.u32 %s776_s29, 4  ;;  %vm358_vm2 = vcmp.lt.s32.totalorder %v355_v11, 4 }
  0x24   : > { %s234_s7 = scalar_lea.vmem %s817_s1, %s574_s30  ;;  %s242_s24 = scalar_lea.vmem %s820_s4, %s574_s30 }
  0x25   : > { %v244_v1 = vld [vmem:[%s234_s7] sm:$0xff]  ;;  %v245_v2 = vld [vmem:[%s234_s7 + $0x8] sm:$0xff] }
  0x26   : > { %v609_v3 = vpack.c.bf16 %v245_v2, %v244_v1  ;;  %v362_v21 = vstv %s361_s20 }
  0x28   : > { %610 = vmatprep.subr.bf16.mxu0 %v609_v3 }
  0x29   : > { %612 = vmatpush3.bf16.msra.mxu0 %v609_v3 }
  0x2c   : > { %593 = vmatmul.mubr.msk.f32.vlgmr.msra.gmra.mrb[0].mxu0 %vm250_vm0, %v247_v4 }
  0x2d   : > { %595 = vmatprep.mubr.msk.f32.mxu0 %vm250_vm0, %v248_v5 }
  0x30   : > { %596 = vmatmul.mubr.msk.f32.gmra.mrb[2].mxu0 %vm250_vm0, %v249_v6 }
  0xff   : > { %v594_v9 = vpop.f32.mrb[0].mxu0 }
 0x100   : > { %v329_v10 = vpop.f32.mrb[1].mxu0  ;;  %v349_v14 = vmul.f32 %v594_v9, %v594_v9 }
 0x101   : > { %v613_v12 = vpack.c.bf16 %v594_v9, %v329_v10  ;;  %v348_v17 = vmul.f32 %v329_v10, %v329_v10 }
 0x103   : > { %v597_v13 = vpop.f32.mrb[2].mxu0 }
 0x104   : > { %v351_v15 = vmul.f32 %v597_v13, %v597_v13  ;;  %v339_v16 = vpop.f32.mrb[3].mxu0 }
 0x105   : > { %v350_v18 = vmul.f32 %v339_v16, %v339_v16  ;;  %v619_v19 = vpack.c.bf16 %v597_v13, %v339_v16 }
 0x106   : > { %v353_v20 = vadd.f32 %v351_v15, %v349_v14 }
 0x107   : > { %v352_v22 = vadd.f32 %v350_v18, %v348_v17 }
 0x108   : > { %v360_v23 = vsel %vm358_vm2, 0.0, %v353_v20 }
 0x109   : > { %v359_v24 = vsel %vm358_vm2, 0.0, %v352_v22  ;;  %vm364_vm3 = vcmp.gt.f32.partialorder %v360_v23, %v362_v21 }
 0x10a   : > { %vm363_vm4 = vcmp.gt.f32.partialorder %v359_v24, %v362_v21 }
 0x10b   : > { %vm614_vm5 = vmpackc.low %vm364_vm3, %vm363_vm4 }
 0x10c   : > { %615 = vmatprep.subr.msk.bf16.mxu1 %vm614_vm5, %v613_v12 }
 0x10d   : > { %618 = vmatpush3.bf16.msk.msra.mxu1 %vm614_vm5, %v613_v12 }
 0x10e   : > { %621 = vmatprep.subr.msk.bf16.mxu1 %vm614_vm5, %v619_v19 }
 0x111   : > { %624 = vmatpush3.bf16.msk.msra.mxu1 %vm614_vm5, %v619_v19 }
 0x114   : > { %607 = vmatmul.mubr.msk.f32.vlgmr.msra.gmra.mrb[0].mxu1 %vm371_vm1, %v370_v25 }
 0x1e7   : > { %v608_v26 = vpop.f32.mrb[0].mxu1 }
 0x1e8   : > { %454 = vst [vmem:[%s242_s24 + $0x8] sm:$0xff] %v608_v26  ;;  %v444_v27 = vpop.f32.mrb[1].mxu1 }
 0x1e9   : > { %453 = vst [vmem:[%s242_s24] sm:$0xff] %v444_v27 }
 0x1ea PF: > { %s15_s17 = sadd.s32 1, %s701_s17   ;;  %s823_s15 = smov %s697_s16 }
 0x1eb   : > { %p12_p2 = scmp.ge.s32.totalorder %s15_s17, 5   ;;  %s824_s16 = smov %s826_s19 }
 0x1ed   :  { %14 = sbr.rel (!%p12_p2) target bundleno = 2 (0x2), region = 71 }
 0x1f4   :  { %482 = vsyncpa [#allocation3], 1 }
 0x1f5   :  { %484 = vsyncpa [#allocation3 + $0x1], 1 }

</bundles_post_ra>
